<compile_context>
chip_gen: v7x
topology: tpu7x:2x2x1
jax: 0.10.0
libtpu: 0.0.40
codegen_flags: <defaults>
</compile_context>

<pallas_src>
import functools

import jax
import jax.numpy as jnp
from jax.experimental import pallas as pl
from jax.experimental.pallas import tpu as pltpu


_LANES = 128


def _sublane_multiple(dtype) -> int:
    """Second-to-last-dim tiling multiple: 8 for f32, 16 for bf16, 32 for int8."""
    bits = jnp.dtype(dtype).itemsize * 8
    return max(8, 256 // bits)


def _vmem_capacity_bytes() -> int:
    try:
        return int(pltpu.get_tpu_info().vmem_capacity_bytes)
    except Exception:
        return 64 << 20  # conservative: v7x has the smallest per-TC VMEM


def _budgets():
    """Generation-aware (target_block, max_block, vmem_floor, vmem_ceiling) in bytes."""
    vmem = _vmem_capacity_bytes()
    if vmem >= (96 << 20):            # v5e / v6e: 128 MiB physical VMEM
        target, max_blk, ceil = 12 << 20, 12 << 20, 80 << 20
    else:                             # v7x: 64 MiB physical VMEM per TensorCore
        target, max_blk, ceil = 5 << 20, 6 << 20, 48 << 20
    floor = 32 << 20                  # above v5e's 16 MiB scoped default
    ceil = max(floor, min(ceil, vmem - (8 << 20)))
    return target, max_blk, floor, ceil


def _largest_divisor_at_most(n, cap):
    cap = max(1, min(n, int(cap)))
    for d in range(cap, 0, -1):
        if n % d == 0:
            return d
    return 1


def _choose_hw_block(hw, padded_cg, itemsize, max_block_bytes):
    """Return (hw_padded, hw_blk): lane-aligned hw_blk dividing hw_padded whose
    sublane-padded (padded_cg, hw_blk) tile fits max_block_bytes (or the full
    extent if it already fits)."""
    if padded_cg * hw * itemsize <= max_block_bytes:
        return hw, hw                                  # full-extent block is legal
    hw_p = ((hw + _LANES - 1) // _LANES) * _LANES       # pad so lane-aligned splits exist
    k = hw_p // _LANES
    for d in range(k, 0, -1):
        if k % d == 0 and padded_cg * (d * _LANES) * itemsize <= max_block_bytes:
            return hw_p, d * _LANES
    return hw_p, _LANES


def _pgn_kernel(x_ref, wb_ref, o_ref, *, inv_cg, eps):
    # x_ref: (bng, Cg, hw_blk) lane-dense; wb_ref: (2, hw_blk) = [weight; bias].
    x = x_ref[...].astype(jnp.float32)

    # Single-pass pointwise variance over channels-within-group (axis=1),
    # unbiased=False; max(., 0) guards the E[x^2] - mean^2 cancellation.
    # TODO(synk): use the two-pass (x - mean) form if inputs can have |mean| >> std.
    s1 = jnp.sum(x, axis=1, keepdims=True)
    s2 = jnp.sum(x * x, axis=1, keepdims=True)
    mean = s1 * inv_cg
    var = jnp.maximum(s2 * inv_cg - mean * mean, 0.0)
    inv = jax.lax.rsqrt(var + eps)                     # EUP slot, effectively free

    wb = wb_ref[...].astype(jnp.float32)
    w = wb[0].reshape(1, 1, -1)
    b = wb[1].reshape(1, 1, -1)
    scale = inv * w                                    # (bng, 1, hw_blk): affine folded
    o_ref[...] = (x * scale + b).astype(o_ref.dtype)   # one mul + one add per element


def pointwise_group_norm_scaling(x, weight=None, bias=None, *, num_groups, eps=1e-5):
    N, C, H, W = x.shape
    if C % num_groups != 0:
        raise ValueError("num_channels must be divisible by num_groups")
    G = num_groups
    Cg = C // G

    # PyTorch's `out * weight` (weight shape (C,)) broadcasts RIGHT-aligned, i.e.
    # against the LAST (W) axis -> the reference module requires W == C for affine.
    if weight is None:                 # affine=False -> identity affine over W
        weight = jnp.ones((W,), dtype=x.dtype)
        bias = jnp.zeros((W,), dtype=x.dtype)
    else:
        if bias is None:
            bias = jnp.zeros_like(weight)
        if weight.shape[-1] != W:
            raise ValueError("reference affine broadcast requires last dim == num_channels")

    NG, HW = N * G, H * W
    itemsize = jnp.dtype(x.dtype).itemsize
    padded_cg = -(-Cg // _sublane_multiple(x.dtype)) * _sublane_multiple(x.dtype)

    target_blk, max_blk, vmem_floor, vmem_ceil = _budgets()

    # Lane-dense layout: (N,C,H,W) -> (NG, Cg, HW).  weight/bias tiled to HW so flat
    # position k = h*W + w picks weight[w] (right-aligned broadcast preserved), then
    # stacked into a single (2, HW) array (one DMA stream, shared sublane padding).
    x3 = x.reshape(NG, Cg, HW)
    wb = jnp.stack([jnp.tile(weight, H), jnp.tile(bias, H)], axis=0)   # (2, HW)

    HW_p, hw_blk = _choose_hw_block(HW, padded_cg, itemsize, max_blk)
    if HW_p != HW:
        x3 = jnp.pad(x3, ((0, 0), (0, 0), (0, HW_p - HW)))
        wb = jnp.pad(wb, ((0, 0), (0, HW_p - HW)))
    hw_steps = HW_p // hw_blk

    # Coalesce (n, g) row-groups up to the target block size; keep >= 2 steps on the
    # megacore-sharded grid axis when HW collapses to a single block (v7x).
    row_bytes_padded = padded_cg * hw_blk * itemsize
    cap_rows = max(1, target_blk // max(row_bytes_padded, 1))
    if hw_steps == 1 and NG >= 2:
        cap_rows = min(cap_rows, max(1, NG // 2))
    bng = _largest_divisor_at_most(NG, cap_rows)
    ng_steps = NG // bng

    # Real double-buffered VMEM footprint incl. (8,128) tile padding.
    wb_itemsize = jnp.dtype(wb.dtype).itemsize
    x_blk_bytes = bng * row_bytes_padded
    wb_blk_bytes = _sublane_multiple(wb.dtype) * hw_blk * wb_itemsize
    need = 4 * x_blk_bytes + 2 * wb_blk_bytes + (2 << 20)
    vmem_limit = int(min(vmem_ceil, max(vmem_floor, need)))

    if hw_steps > 1:
        # HW outer / NG inner: wb block index constant across the inner sweep ->
        # Pallas block-revisit skips its re-DMA (wb read from HBM ~once total).
        grid = (hw_steps, ng_steps)
        x_map = lambda j, i: (i, 0, j)
        wb_map = lambda j, i: (0, j)
    else:
        # Single HW block: wb index is always (0, 0); keep NG as grid[0].
        grid = (ng_steps, hw_steps)
        x_map = lambda i, j: (i, 0, j)
        wb_map = lambda i, j: (0, j)

    cost = pl.CostEstimate(
        flops=int(6 * NG * Cg * HW_p),
        transcendentals=int(NG * HW_p),
        bytes_accessed=int(2 * x3.size * itemsize + wb.size * wb_itemsize),
    )

    kernel = functools.partial(_pgn_kernel, inv_cg=float(1.0 / Cg), eps=float(eps))

    out3 = pl.pallas_call(
        kernel,
        out_shape=jax.ShapeDtypeStruct((NG, Cg, HW_p), x.dtype),
        grid_spec=pltpu.PrefetchScalarGridSpec(
            num_scalar_prefetch=0,
            grid=grid,
            in_specs=[
                pl.BlockSpec((bng, Cg, hw_blk), x_map),
                pl.BlockSpec((2, hw_blk), wb_map),
            ],
            out_specs=pl.BlockSpec((bng, Cg, hw_blk), x_map),
        ),
        compiler_params=pltpu.CompilerParams(
            dimension_semantics=("parallel", "parallel"),
            vmem_limit_bytes=vmem_limit,
        ),
        cost_estimate=cost,
    )(x3, wb)

    if HW_p != HW:
        out3 = out3[:, :, :HW]
    return out3.reshape(N, C, H, W)


def _reference(x, weight, bias, *, num_groups, eps=1e-5):
    # Pure-JAX transliteration of the PyTorch forward() for verification.
    N, C, H, W = x.shape
    xr = x.reshape(N, num_groups, C // num_groups, H, W)
    var = jnp.var(xr, axis=2, keepdims=True)            # unbiased=False (ddof=0)
    out = xr / jnp.sqrt(var + eps)
    out = out.reshape(N, C, H, W)
    out = out * weight + bias                            # right-aligned broadcast
    return out


if __name__ == "__main__":
    num_groups = 2
    num_channels = 16
    N, H = 2, 32
    W = num_channels  # required by the reference module's affine broadcast (W == C)

    key = jax.random.PRNGKey(0)
    kx, kw, kb = jax.random.split(key, 3)
    x = jax.random.normal(kx, (N, num_channels, H, W), dtype=jnp.float32)

    # Non-trivial affine params to exercise the stacked weight/bias path
    # (reset_parameters() would give ones/zeros, making affine a no-op).
    weight = 1.0 + 0.1 * jax.random.normal(kw, (num_channels,), dtype=jnp.float32)
    bias = 0.1 * jax.random.normal(kb, (num_channels,), dtype=jnp.float32)

    fn = jax.jit(functools.partial(pointwise_group_norm_scaling,
                                   num_groups=num_groups, eps=1e-5))
    out = jax.block_until_ready(fn(x, weight, bias))

    ref = _reference(x, weight, bias, num_groups=num_groups, eps=1e-5)
    assert out.shape == ref.shape and out.dtype == ref.dtype
    tol = 1e-5 + 1e-5 * jnp.abs(ref)
    assert bool(jnp.all(jnp.abs(out - ref) <= tol)), "mismatch vs reference"

    print("KERNEL_OK")
</pallas_src>

<mosaic_0001>
module attributes {stable_mosaic.version = 11 : i64} {
  func.func @_pgn_kernel(%arg0: i32, %arg1: i32, %arg2: memref<2x8x512xf32, #tpu.memory_space<vmem>>, %arg3: memref<2x512xf32, #tpu.memory_space<vmem>>, %arg4: memref<2x8x512xf32, #tpu.memory_space<vmem>>) attributes {dimension_semantics = [#tpu.dimension_semantics<parallel>, #tpu.dimension_semantics<parallel>], iteration_bounds = array<i64: 2, 1>, scalar_prefetch = 0 : i64, scratch_operands = 0 : i64, tpu.core_type = #tpu.core_type<tc>, window_params = [{transform_indices = @transform_0, window_bounds = array<i64: 2, 8, 512>}, {transform_indices = @transform_1, window_bounds = array<i64: 2, 512>}, {transform_indices = @transform_2, window_bounds = array<i64: 2, 8, 512>}]} {
    %c0 = arith.constant 0 : index
    %c0_0 = arith.constant 0 : index
    %c0_1 = arith.constant 0 : index
    %0 = vector.load %arg2[%c0, %c0_0, %c0_1] : memref<2x8x512xf32, #tpu.memory_space<vmem>>, vector<2x8x512xf32>
    %cst = arith.constant dense<0.000000e+00> : vector<2x512xf32>
    %1 = vector.multi_reduction <add>, %0, %cst [1] : vector<2x8x512xf32> to vector<2x512xf32>
    %2 = vector.shape_cast %1 : vector<2x512xf32> to vector<2x1x512xf32>
    %3 = arith.mulf %0, %0 : vector<2x8x512xf32>
    %cst_2 = arith.constant dense<0.000000e+00> : vector<2x512xf32>
    %4 = vector.multi_reduction <add>, %3, %cst_2 [1] : vector<2x8x512xf32> to vector<2x512xf32>
    %5 = vector.shape_cast %4 : vector<2x512xf32> to vector<2x1x512xf32>
    %cst_3 = arith.constant 1.250000e-01 : f32
    %6 = vector.broadcast %cst_3 : f32 to vector<2x1x512xf32>
    %7 = arith.mulf %2, %6 : vector<2x1x512xf32>
    %cst_4 = arith.constant 1.250000e-01 : f32
    %8 = vector.broadcast %cst_4 : f32 to vector<2x1x512xf32>
    %9 = arith.mulf %5, %8 : vector<2x1x512xf32>
    %10 = arith.mulf %7, %7 : vector<2x1x512xf32>
    %11 = arith.subf %9, %10 : vector<2x1x512xf32>
    %cst_5 = arith.constant 0.000000e+00 : f32
    %12 = vector.broadcast %cst_5 : f32 to vector<2x1x512xf32>
    %13 = arith.maximumf %11, %12 : vector<2x1x512xf32>
    %cst_6 = arith.constant 9.99999974E-6 : f32
    %14 = vector.broadcast %cst_6 : f32 to vector<2x1x512xf32>
    %15 = arith.addf %13, %14 : vector<2x1x512xf32>
    %16 = math.rsqrt %15 : vector<2x1x512xf32>
    %c0_7 = arith.constant 0 : index
    %c0_8 = arith.constant 0 : index
    %17 = vector.load %arg3[%c0_7, %c0_8] : memref<2x512xf32, #tpu.memory_space<vmem>>, vector<2x512xf32>
    %18 = vector.extract_strided_slice %17 {offsets = [0, 0], sizes = [1, 512], strides = [1, 1]} : vector<2x512xf32> to vector<1x512xf32>
    %19 = vector.shape_cast %18 : vector<1x512xf32> to vector<512xf32>
    %20 = vector.shape_cast %19 : vector<512xf32> to vector<1x1x512xf32>
    %21 = vector.extract_strided_slice %17 {offsets = [1, 0], sizes = [1, 512], strides = [1, 1]} : vector<2x512xf32> to vector<1x512xf32>
    %22 = vector.shape_cast %21 : vector<1x512xf32> to vector<512xf32>
    %23 = vector.shape_cast %22 : vector<512xf32> to vector<1x1x512xf32>
    %24 = vector.broadcast %20 : vector<1x1x512xf32> to vector<2x1x512xf32>
    %25 = arith.mulf %16, %24 : vector<2x1x512xf32>
    %26 = vector.broadcast %25 : vector<2x1x512xf32> to vector<2x8x512xf32>
    %27 = arith.mulf %0, %26 : vector<2x8x512xf32>
    %28 = vector.broadcast %23 : vector<1x1x512xf32> to vector<2x8x512xf32>
    %29 = arith.addf %27, %28 : vector<2x8x512xf32>
    %c0_9 = arith.constant 0 : index
    %c0_10 = arith.constant 0 : index
    %c0_11 = arith.constant 0 : index
    %30 = vector.load %arg4[%c0_9, %c0_10, %c0_11] : memref<2x8x512xf32, #tpu.memory_space<vmem>>, vector<2x8x512xf32>
    tpu.vector_store %arg4[%c0_9, %c0_10, %c0_11], %29 {strides = array<i32>} : memref<2x8x512xf32, #tpu.memory_space<vmem>>, vector<2x8x512xf32>,
    return
  }
  func.func @transform_0(%arg0: i32, %arg1: i32) -> (i32, i32, i32) {
    %c0_i32 = arith.constant 0 : i32
    %c0_i32_0 = arith.constant 0 : i32
    return %arg0, %c0_i32, %arg1 : i32, i32, i32
  }
  func.func @transform_1(%arg0: i32, %arg1: i32) -> (i32, i32) {
    %c0_i32 = arith.constant 0 : i32
    %c0_i32_0 = arith.constant 0 : i32
    return %c0_i32, %arg1 : i32, i32
  }
  func.func @transform_2(%arg0: i32, %arg1: i32) -> (i32, i32, i32) {
    %c0_i32 = arith.constant 0 : i32
    %c0_i32_0 = arith.constant 0 : i32
    return %arg0, %c0_i32, %arg1 : i32, i32, i32
  }
}

</mosaic_0001>

<bundles_post_ra>
// kernel: tile.18
= control target key start
LH: loop header
LB: loop body
LE: loop exit
PB: predicated region body
PF: predicated region fallthrough
CT: control target
= control target key end

     0   :  { %s89_s8 = smov 112   ;;  %s90_s11 = smov 80   ;;  %vm3_vm0 = vcmask 130048   ;;  %vm9_vm1 = vcmask 1048448   ;;  %vm15_vm2 = vcmask 917248   ;;  %vm21_vm3 = vcmask 786048   ;;  %s142_s0 = inlined_call_operand.vmem [shape: f32[32,16], index: 0, kind: input, shape index: {}]   ;;  %s143_s1 = inlined_call_operand.vmem [shape: f32[1,512], index: 1, kind: output, shape index: {}]  }
   0x1   :  { %v72_v0 = vld [vmem:[%s142_s0 + $0x7] ss:$8 sm:$0xf]   ;;  %v74_v1 = vld [vmem:[%s142_s0 + $0x5] ss:$8 sm:$0xf]  }
   0x2   :  { %7 = vrot.lane.b32.xlu0 %v72_v0, %s89_s8  ;;  %19 = vrot.lane.b32.xlu1 %v74_v1, %s90_s11  ;;  %v73_v2 = vld [vmem:[%s142_s0 + $0x6] ss:$8 sm:$0xf]   ;;  %v75_v3 = vld [vmem:[%s142_s0 + $0x4] ss:$8 sm:$0xf]  }
   0x3   :  { %s91_s16 = smov 96   ;;  %v2_v4 = vld [vmem:[%s142_s0] ss:$8 sm:$0xf]   ;;  %s92_s19 = smov 64   ;;  %vm27_vm4 = vcmask 654848  }
   0x4   :  { %v76_v5 = vld [vmem:[%s142_s0 + $0x3] ss:$8 sm:$0xf]   ;;  %4 = vst.msk [vmem:[#allocation0] ss:$8 sm:$0xf] %vm3_vm0, %v2_v4  }
   0x5   :  { %v77_v6 = vld [vmem:[%s142_s0 + $0x2] ss:$8 sm:$0xf]   ;;  %s93_s24 = smov 48   ;;  %s94_s25 = smov 32   ;;  %vm33_vm5 = vcmask 523648  }
   0x6   :  { %13 = vrot.lane.b32.xlu0 %v73_v2, %s91_s16  ;;  %25 = vrot.lane.b32.xlu1 %v75_v3, %s92_s19  ;;  %v78_v7 = vld [vmem:[%s142_s0 + $0x1] ss:$8 sm:$0xf]   ;;  %s95_s0 = smov 16   ;;  %vm39_vm6 = vcmask 392448   ;;  %vm45_vm7 = vcmask 261248  }
   0xa   :  { %31 = vrot.lane.b32.xlu0 %v76_v5, %s93_s24  ;;  %37 = vrot.lane.b32.xlu1 %v77_v6, %s94_s25 }
   0xe   :  { %43 = vrot.lane.b32.xlu0 %v78_v7, %s95_s0 }
  0x74   :  { %v8_v8 = vpop.permute.xlu0 %7   ;;  %v20_v9 = vpop.permute.xlu1 %19  }
  0x75   :  { %10 = vst.msk [vmem:[#allocation0] ss:$8 sm:$0xf] %vm9_vm1, %v8_v8  }
  0x78   :  { %v14_v10 = vpop.permute.xlu0 %13   ;;  %v26_v11 = vpop.permute.xlu1 %25  }
  0x79   :  { %16 = vst.msk [vmem:[#allocation0] ss:$8 sm:$0xf] %vm15_vm2, %v14_v10  }
  0x7a   :  { %22 = vst.msk [vmem:[#allocation0] ss:$8 sm:$0xf] %vm21_vm3, %v20_v9  }
  0x7b   :  { %28 = vst.msk [vmem:[#allocation0] ss:$8 sm:$0xf] %vm27_vm4, %v26_v11  }
  0x7c   :  { %v32_v12 = vpop.permute.xlu0 %31   ;;  %v38_v13 = vpop.permute.xlu1 %37  }
  0x7d   :  { %34 = vst.msk [vmem:[#allocation0] ss:$8 sm:$0xf] %vm33_vm5, %v32_v12  }
  0x7e   :  { %40 = vst.msk [vmem:[#allocation0] ss:$8 sm:$0xf] %vm39_vm6, %v38_v13  }
  0x80   :  { %v44_v14 = vpop.permute.xlu0 %43  }
  0x81   :  { %46 = vst.msk [vmem:[#allocation0] ss:$8 sm:$0xf] %vm45_vm7, %v44_v14  }
  0x88   :  { %v50_v15 = vld [vmem:[#allocation0] sm:$0x1]  ;;  %v54_v16 = vld [vmem:[#allocation0 + $0x8] sm:$0x1]  ;;  %v59_v17 = vld [vmem:[#allocation0 + $0x10] sm:$0x1] }
  0x89   :  { %52 = vst [vmem:[%s143_s1] sm:$0x1] %v50_v15  ;;  %79 = vst [vmem:[%s143_s1 + $0x1] sm:$0x1] %v54_v16  ;;  %v65_v18 = vld [vmem:[#allocation0 + $0x18] sm:$0x1] }
  0x8a   :  { %80 = vst [vmem:[%s143_s1 + $0x2] sm:$0x1] %v59_v17  ;;  %81 = vst [vmem:[%s143_s1 + $0x3] sm:$0x1] %v65_v18 }

// kernel: tile.13
= control target key start
LH: loop header
LB: loop body
LE: loop exit
PB: predicated region body
PF: predicated region fallthrough
CT: control target
= control target key end

     0   :  { %s40_s0 = inlined_call_operand.vmem [shape: f32[16], index: 0, kind: input, shape index: {}]   ;;  %s41_s1 = inlined_call_operand.vmem [shape: f32[32,16], index: 1, kind: output, shape index: {}]  }
   0x1   :  { %v4_v0 = vld [vmem:[%s40_s0] ss:$0 sm:$0xff] }
   0x2   :  { %5 = vst [vmem:[%s41_s1] sm:$0xff] %v4_v0  ;;  %12 = vst [vmem:[%s41_s1 + $0x8] sm:$0xff] %v4_v0 }
   0x3   :  { %13 = vst [vmem:[%s41_s1 + $0x10] sm:$0xff] %v4_v0  ;;  %14 = vst [vmem:[%s41_s1 + $0x18] sm:$0xff] %v4_v0 }

// kernel: pointwise_group_norm_scaling.1
= control target key start
LH: loop header
LB: loop body
LE: loop exit
PB: predicated region body
PF: predicated region fallthrough
CT: control target
= control target key end

     0   :  { %s703_s9 = smov 0   ;;  %s705_s10 = smov 0   ;;  %s878_s0 = inlined_call_operand.vmem [shape: f32[4,8,512], index: 0, kind: input, shape index: {}]   ;;  %s879_s1 = inlined_call_operand.vmem [shape: f32[2,512], index: 1, kind: input, shape index: {}]   ;;  %s880_s2 = inlined_call_operand.vmem [shape: f32[4,8,512], index: 2, kind: output, shape index: {}]  }
   0x1   :  { %s707_s11 = smov 0  }
   0x2 LB: > { %s24_s12 = sadd.s32 1, %s682_s10  ;;  %p613_p0 = scmp.ge.s32.totalorder %s686_s11, 1  ;;  %s686_s11 = sphi %s707_s11, %s12_s11   ;;  %s682_s10 = sphi %s705_s10, %s882_s10   ;;  %s678_s9 = sphi %s703_s9, %s881_s9  }
   0x3   : > { %p26_p1 = scmp.ge.s32.totalorder %s24_s12, 2  ;;  %p146_p2 = scmp.lt.s32.totalorder %s686_s11, 3 }
   0x5   : > { %s884_s12 = smov (%p26_p1, %s24_s12), 0  ;;  %p147_p3 = pnand %p613_p0, %p146_p2 }
   0x6   : > { %s614_s13 = sshll.u32 (!%p147_p3), %s678_s9, 1  ;;  %v383_v0 = vlaneseq (!%p147_p3)  ;;  %v381_v2 = vld [vmem:[%s879_s1] sm:$0xff] (!%p147_p3) }
   0x7   : > { %150 = sbr.rel (%p147_p3) target bundleno = 92 (0x5c), region = 28  ;;  %p185_p4 = scmp.lt.s32.totalorder (!%p147_p3), %s614_s13, 3 }
   0x8   : > { %v384_v1 = vshrl.u32 (!%p147_p3), %v383_v0, 7 }
   0xa   : > { %v726_v3 = vsub.s32 (!%p147_p3), 0, %v384_v1  ;;  %v728_v4 = vsub.s32 (!%p147_p3), 1, %v384_v1  ;;  %v389_v5 = vsub.s32 (!%p147_p3), 2, %v384_v1  ;;  %v457_v6 = vsub.s32 (!%p147_p3), 3, %v384_v1 }
   0xb   : > { %v393_v7 = vsub.s32 (!%p147_p3), 4, %v384_v1  ;;  %v461_v8 = vsub.s32 (!%p147_p3), 5, %v384_v1  ;;  %v397_v9 = vsub.s32 (!%p147_p3), 6, %v384_v1  ;;  %v465_v10 = vsub.s32 (!%p147_p3), 7, %v384_v1 }
   0xc   : > { %v739_v11 = vrot.slane (!%p147_p3), %v381_v2, %v726_v3  ;;  %v454_v12 = vrot.slane (!%p147_p3), %v381_v2, %v728_v4  ;;  %v458_v13 = vrot.slane (!%p147_p3), %v381_v2, %v457_v6  ;;  %v748_v16 = vrot.slane (!%p147_p3), %v381_v2, %v389_v5 }
   0xd   : > { %v753_v18 = vrot.slane (!%p147_p3), %v381_v2, %v393_v7  ;;  %v755_v19 = vrot.slane (!%p147_p3), %v381_v2, %v461_v8  ;;  %v757_v20 = vrot.slane (!%p147_p3), %v381_v2, %v397_v9  ;;  %v766_v25 = vrot.slane (!%p147_p3), %v381_v2, %v465_v10 }
   0xe   : > { %s886_s13 = smov (!%p185_p4, %s614_s13), 3  ;;  %v769_v26 = vrot.slane %v454_v12, %v728_v4  ;;  %v779_v33 = vrot.slane %v458_v13, %v728_v4 }
   0xf   : > { %s622_s16 = sshll.u32 %s886_s13, 5 }
  0x10   : > { %s736_s19 = scalar_lea.vmem %s878_s0, %s622_s16  ;;  %s835_s22 = scalar_lea.vmem %s880_s2, %s622_s16 }
  0x11   : > { %v743_v14 = vld [vmem:[%s736_s19] sm:$0xff]  ;;  %v746_v15 = vld [vmem:[%s736_s19 + $0x8] sm:$0xff]  ;;  %v751_v17 = vld [vmem:[%s736_s19 + $0x10] sm:$0xff] }
  0x12   : > { %v221_v21 = vrot.slane %v743_v14, 4  ;;  %v269_v22 = vmul.f32 %v743_v14, %v743_v14  ;;  %v227_v23 = vrot.slane %v746_v15, 4  ;;  %v764_v24 = vld [vmem:[%s736_s19 + $0x18] sm:$0xff]  ;;  %v270_v27 = vmul.f32 %v746_v15, %v746_v15 }
  0x13   : > { %v233_v28 = vrot.slane %v751_v17, 4  ;;  %v271_v29 = vmul.f32 %v751_v17, %v751_v17  ;;  %v239_v37 = vrot.slane %v764_v24, 4  ;;  %v272_v41 = vmul.f32 %v764_v24, %v764_v24 }
  0x14   : > { %v222_v30 = vadd.f32 %v221_v21, %v743_v14  ;;  %v277_v31 = vrot.slane %v269_v22, 4  ;;  %v228_v32 = vadd.f32 %v227_v23, %v746_v15  ;;  %v283_v34 = vrot.slane %v270_v27, 4 }
  0x15   : > { %v234_v35 = vadd.f32 %v233_v28, %v751_v17  ;;  %v289_v36 = vrot.slane %v271_v29, 4  ;;  %v240_v45 = vadd.f32 %v239_v37, %v764_v24  ;;  %v295_v49 = vrot.slane %v272_v41, 4  ;;  %v790_v37 = vld [vmem:[%s736_s19 + $0x28] sm:$0xff] }
  0x16   : > { %v223_v38 = vrot.slane %v222_v30, 2  ;;  %v278_v39 = vadd.f32 %v277_v31, %v269_v22  ;;  %v229_v40 = vrot.slane %v228_v32, 2  ;;  %v284_v42 = vadd.f32 %v283_v34, %v270_v27  ;;  %v787_v27 = vld [vmem:[%s736_s19 + $0x20] sm:$0xff] }
  0x17   : > { %v235_v43 = vrot.slane %v234_v35, 2  ;;  %v290_v44 = vadd.f32 %v289_v36, %v271_v29  ;;  %v241_v53 = vrot.slane %v240_v45, 2  ;;  %v296_v57 = vadd.f32 %v295_v49, %v272_v41 }
  0x18   : > { %v224_v46 = vadd.f32 %v223_v38, %v222_v30  ;;  %v279_v47 = vrot.slane %v278_v39, 2  ;;  %v230_v48 = vadd.f32 %v229_v40, %v228_v32  ;;  %v285_v50 = vrot.slane %v284_v42, 2 }
  0x19   : > { %v236_v51 = vadd.f32 %v235_v43, %v234_v35  ;;  %v291_v52 = vrot.slane %v290_v44, 2  ;;  %v242_v61 = vadd.f32 %v241_v53, %v240_v45  ;;  %v297_v1 = vrot.slane %v296_v57, 2 }
  0x1a   : > { %v225_v54 = vrot.slane %v224_v46, 1  ;;  %v280_v55 = vadd.f32 %v279_v47, %v278_v39  ;;  %v231_v56 = vrot.slane %v230_v48, 1  ;;  %v286_v58 = vadd.f32 %v285_v50, %v284_v42 }
  0x1b   : > { %v237_v59 = vrot.slane %v236_v51, 1  ;;  %v292_v60 = vadd.f32 %v291_v52, %v290_v44  ;;  %v243_v7 = vrot.slane %v242_v61, 1  ;;  %v298_v12 = vadd.f32 %v297_v1, %v296_v57  ;;  %v805_v57 = vld [vmem:[%s736_s19 + $0x30] sm:$0xff] }
  0x1c   : > { %v226_v62 = vadd.f32 %v225_v54, %v224_v46  ;;  %v281_v63 = vrot.slane %v280_v55, 1  ;;  %v232_v0 = vadd.f32 %v231_v56, %v230_v48  ;;  %v287_v2 = vrot.slane %v286_v58, 1 }
  0x1d   : > { %v238_v5 = vadd.f32 %v237_v59, %v236_v51  ;;  %v293_v6 = vrot.slane %v292_v60, 1  ;;  %v244_v23 = vadd.f32 %v243_v7, %v242_v61  ;;  %v299_v31 = vrot.slane %v298_v12, 1 }
  0x1e   : > { %v282_v8 = vadd.f32 %v281_v63, %v280_v55  ;;  %v325_v9 = vmul.f32 0.125, %v226_v62  ;;  %v326_v10 = vmul.f32 0.125, %v232_v0  ;;  %v288_v13 = vadd.f32 %v287_v2, %v286_v58 }
  0x1f   : > { %v294_v21 = vadd.f32 %v293_v6, %v292_v60  ;;  %v327_v22 = vmul.f32 0.125, %v238_v5  ;;  %v328_v36 = vmul.f32 0.125, %v244_v23  ;;  %v794_v39 = vrot.slane %v755_v19, %v728_v4  ;;  %v809_v6 = vld [vmem:[%s736_s19 + $0x38] sm:$0xff] }
  0x20   : > { %v333_v28 = vmul.f32 0.125, %v282_v8  ;;  %v341_v29 = vmul.f32 %v325_v9, %v325_v9  ;;  %v342_v30 = vmul.f32 %v326_v10, %v326_v10  ;;  %v334_v32 = vmul.f32 0.125, %v288_v13 }
  0x21   : > { %v335_v34 = vmul.f32 0.125, %v294_v21  ;;  %v343_v35 = vmul.f32 %v327_v22, %v327_v22  ;;  %v300_v40 = vadd.f32 %v299_v31, %v298_v12  ;;  %v245_v41 = vrot.slane %v787_v27, 4 }
  0x22   : > { %v349_v38 = vsub.f32 %v333_v28, %v341_v29  ;;  %v350_v42 = vsub.f32 %v334_v32, %v342_v30  ;;  %v344_v44 = vmul.f32 %v328_v36, %v328_v36  ;;  %v273_v45 = vmul.f32 %v787_v27, %v787_v27 }
  0x23   : > { %v351_v43 = vsub.f32 %v335_v34, %v343_v35  ;;  %v336_v47 = vmul.f32 0.125, %v300_v40  ;;  %v246_v48 = vadd.f32 %v245_v41, %v787_v27  ;;  %v251_v49 = vrot.slane %v790_v37, 4 }
  0x24   : > { %v357_v46 = vmax.f32 %v349_v38, 0.0  ;;  %v358_v50 = vmax.f32 %v350_v42, 0.0  ;;  %v301_v19 = vrot.slane %v273_v45, 4  ;;  %v274_v52 = vmul.f32 %v790_v37, %v790_v37 }
  0x25   : > { %v359_v51 = vmax.f32 %v351_v43, 0.0  ;;  %v352_v54 = vsub.f32 %v336_v47, %v344_v44  ;;  %v247_v55 = vrot.slane %v246_v48, 2  ;;  %v252_v56 = vadd.f32 %v251_v49, %v790_v37 }
  0x26   : > { %v365_v53 = vadd.f32 1e-05, %v357_v46  ;;  %v366_v58 = vadd.f32 1e-05, %v358_v50  ;;  %v302_v60 = vadd.f32 %v301_v19, %v273_v45  ;;  %v307_v61 = vrot.slane %v274_v52, 4 }
  0x27   : > { %v367_v59 = vadd.f32 1e-05, %v359_v51  ;;  %v360_v62 = vmax.f32 %v352_v54, 0.0  ;;  %v248_v63 = vadd.f32 %v247_v55, %v246_v48  ;;  %v253_v0 = vrot.slane %v252_v56, 2 }
  0x28   : > { %648 = vrsqrt.f32 %v365_v53  ;;  %v303_v1 = vrot.slane %v302_v60, 2  ;;  %v308_v2 = vadd.f32 %v307_v61, %v274_v52  ;;  %v257_v5 = vrot.slane %v805_v57, 4 }
  0x29   : > { %650 = vrsqrt.f32 %v366_v58  ;;  %v368_v7 = vadd.f32 1e-05, %v360_v62  ;;  %v249_v8 = vrot.slane %v248_v63, 1  ;;  %v254_v9 = vadd.f32 %v253_v0, %v252_v56 }
  0x2a   : > { %652 = vrsqrt.f32 %v367_v59  ;;  %v304_v10 = vadd.f32 %v303_v1, %v302_v60  ;;  %v309_v12 = vrot.slane %v308_v2, 2  ;;  %v258_v13 = vadd.f32 %v257_v5, %v805_v57 }
  0x2b   : > { %v275_v21 = vmul.f32 %v805_v57, %v805_v57  ;;  %654 = vrsqrt.f32 %v368_v7  ;;  %v250_v22 = vadd.f32 %v249_v8, %v248_v63  ;;  %v255_v23 = vrot.slane %v254_v9, 1 }
  0x2c   : > { %v263_v28 = vrot.slane %v809_v6, 4  ;;  %v305_v29 = vrot.slane %v304_v10, 1  ;;  %v310_v30 = vadd.f32 %v309_v12, %v308_v2  ;;  %v259_v31 = vrot.slane %v258_v13, 2 }
  0x2d   : > { %v313_v32 = vrot.slane %v275_v21, 4  ;;  %v329_v34 = vmul.f32 0.125, %v250_v22  ;;  %v256_v35 = vadd.f32 %v255_v23, %v254_v9  ;;  %v276_v38 = vmul.f32 %v809_v6, %v809_v6 }
  0x2e   : > { %v264_v36 = vadd.f32 %v263_v28, %v809_v6  ;;  %v306_v40 = vadd.f32 %v305_v29, %v304_v10  ;;  %v311_v41 = vrot.slane %v310_v30, 1  ;;  %v260_v42 = vadd.f32 %v259_v31, %v258_v13 }
  0x2f   : > { %v314_v43 = vadd.f32 %v313_v32, %v275_v21  ;;  %v345_v44 = vmul.f32 %v329_v34, %v329_v34  ;;  %v330_v45 = vmul.f32 0.125, %v256_v35  ;;  %v319_v47 = vrot.slane %v276_v38, 4 }
  0x30   : > { %v265_v46 = vrot.slane %v264_v36, 2  ;;  %v337_v48 = vmul.f32 0.125, %v306_v40  ;;  %v312_v49 = vadd.f32 %v311_v41, %v310_v30  ;;  %v261_v50 = vrot.slane %v260_v42, 1 }
  0x31   : > { %v315_v51 = vrot.slane %v314_v43, 2  ;;  %v820_v52 = vrot.slane %v766_v25, %v728_v4  ;;  %v346_v53 = vmul.f32 %v330_v45, %v330_v45  ;;  %v320_v55 = vadd.f32 %v319_v47, %v276_v38 }
  0x32   : > { %v649_v19 = vpop.eup %648  ;;  %v266_v54 = vadd.f32 %v265_v46, %v264_v36  ;;  %v353_v59 = vsub.f32 %v337_v48, %v345_v44  ;;  %v338_v60 = vmul.f32 0.125, %v312_v49  ;;  %v262_v61 = vadd.f32 %v261_v50, %v260_v42 }
  0x33   : > { %v651_v56 = vpop.eup %650  ;;  %v403_v58 = vmul.f32 %v649_v19, %v739_v11  ;;  %v316_v0 = vadd.f32 %v315_v51, %v314_v43  ;;  %v321_v2 = vrot.slane %v320_v55, 2 }
  0x34   : > { %v653_v62 = vpop.eup %652  ;;  %v404_v63 = vmul.f32 %v651_v56, %v748_v16  ;;  %v267_v1 = vrot.slane %v266_v54, 1  ;;  %v361_v25 = vmax.f32 %v353_v59, 0.0  ;;  %v354_v7 = vsub.f32 %v338_v60, %v346_v53 }
  0x35   : > { %v414_v5 = vrot.slane %v403_v58, %v726_v3  ;;  %v405_v4 = vmul.f32 %v653_v62, %v753_v18  ;;  %v655_v8 = vpop.eup %654  ;;  %v317_v10 = vrot.slane %v316_v0, 1  ;;  %v331_v12 = vmul.f32 0.125, %v262_v61 }
  0x36   : > { %v418_v9 = vrot.slane %v404_v63, %v726_v3  ;;  %v268_v13 = vadd.f32 %v267_v1, %v266_v54  ;;  %v406_v23 = vmul.f32 %v655_v8, %v757_v20  ;;  %v369_v28 = vadd.f32 1e-05, %v361_v25 }
  0x37   : > { %v443_v21 = vmul.f32 %v414_v5, %v743_v14  ;;  %v422_v22 = vrot.slane %v405_v4, %v726_v3  ;;  %v362_v30 = vmax.f32 %v354_v7, 0.0  ;;  %v318_v31 = vadd.f32 %v317_v10, %v316_v0 }
  0x38   : > { %v444_v29 = vmul.f32 %v418_v9, %v746_v15  ;;  %v347_v32 = vmul.f32 %v331_v12, %v331_v12  ;;  %v426_v35 = vrot.slane %v406_v23, %v726_v3  ;;  %656 = vrsqrt.f32 %v369_v28 }
  0x39   : > { %v487_v14 = vadd.f32 %v769_v26, %v443_v21  ;;  %v445_v34 = vmul.f32 %v422_v22, %v751_v17  ;;  %v370_v38 = vadd.f32 1e-05, %v362_v30  ;;  %v339_v40 = vmul.f32 0.125, %v318_v31 }
  0x3a   : > { %v488_v36 = vadd.f32 %v779_v33, %v444_v29  ;;  %v322_v41 = vadd.f32 %v321_v2, %v320_v55  ;;  %v446_v42 = vmul.f32 %v426_v35, %v764_v24  ;;  %v332_v43 = vmul.f32 0.125, %v268_v13 }
  0x3b   : > { %495 = vst [vmem:[%s835_s22] sm:$0xff] %v487_v14  ;;  %v489_v15 = vadd.f32 %v794_v39, %v445_v34  ;;  %658 = vrsqrt.f32 %v370_v38  ;;  %v355_v44 = vsub.f32 %v339_v40, %v347_v32 }
  0x3c   : > { %496 = vst [vmem:[%s835_s22 + $0x8] sm:$0xff] %v488_v36  ;;  %v323_v45 = vrot.slane %v322_v41, 1  ;;  %v490_v17 = vadd.f32 %v820_v52, %v446_v42  ;;  %v348_v48 = vmul.f32 %v332_v43, %v332_v43 }
  0x3d   : > { %497 = vst [vmem:[%s835_s22 + $0x10] sm:$0xff] %v489_v15  ;;  %v363_v46 = vmax.f32 %v355_v44, 0.0 }
  0x3e   : > { %v324_v47 = vadd.f32 %v323_v45, %v322_v41  ;;  %498 = vst [vmem:[%s835_s22 + $0x18] sm:$0xff] %v490_v17 }
  0x3f   : > { %v371_v49 = vadd.f32 1e-05, %v363_v46 }
  0x40   : > { %v340_v50 = vmul.f32 0.125, %v324_v47 }
  0x41   : > { %660 = vrsqrt.f32 %v371_v49 }
  0x42   : > { %v356_v51 = vsub.f32 %v340_v50, %v348_v48  ;;  %v657_v19 = vpop.eup %656 }
  0x43   : > { %v407_v24 = vmul.f32 %v657_v19, %v739_v11 }
  0x44   : > { %v364_v53 = vmax.f32 %v356_v51, 0.0 }
  0x45   : > { %v659_v54 = vpop.eup %658  ;;  %v430_v55 = vrot.slane %v407_v24, %v726_v3 }
  0x46   : > { %v372_v56 = vadd.f32 1e-05, %v364_v53  ;;  %v408_v58 = vmul.f32 %v659_v54, %v748_v16 }
  0x47   : > { %v447_v59 = vmul.f32 %v430_v55, %v787_v27 }
  0x48   : > { %662 = vrsqrt.f32 %v372_v56  ;;  %v434_v60 = vrot.slane %v408_v58, %v726_v3 }
  0x49   : > { %v491_v61 = vadd.f32 %v769_v26, %v447_v59 }
  0x4a   : > { %v448_v62 = vmul.f32 %v434_v60, %v790_v37 }
  0x4b   : > { %v661_v63 = vpop.eup %660  ;;  %499 = vst [vmem:[%s835_s22 + $0x20] sm:$0xff] %v491_v61 }
  0x4c   : > { %v492_v11 = vadd.f32 %v779_v33, %v448_v62  ;;  %v409_v0 = vmul.f32 %v661_v63, %v753_v18 }
  0x4e   : > { %500 = vst [vmem:[%s835_s22 + $0x28] sm:$0xff] %v492_v11  ;;  %v438_v16 = vrot.slane %v409_v0, %v726_v3 }
  0x50   : > { %v449_v1 = vmul.f32 %v438_v16, %v805_v57 }
  0x52   : > { %v663_v27 = vpop.eup %662  ;;  %v493_v2 = vadd.f32 %v794_v39, %v449_v1 }
  0x53   : > { %v410_v5 = vmul.f32 %v663_v27, %v757_v20 }
  0x54   : > { %501 = vst [vmem:[%s835_s22 + $0x30] sm:$0xff] %v493_v2 }
  0x55   : > { %v442_v26 = vrot.slane %v410_v5, %v726_v3 }
  0x57   : > { %v450_v37 = vmul.f32 %v442_v26, %v809_v6 }
  0x59   : > { %v494_v4 = vadd.f32 %v820_v52, %v450_v37 }
  0x5b   : > { %502 = vst [vmem:[%s835_s22 + $0x38] sm:$0xff] %v494_v4 }
  0x5c PF: > { %s12_s11 = sadd.s32 1, %s686_s11   ;;  %s881_s9 = smov %s682_s10 }
  0x5d   : > { %p9_p5 = scmp.ge.s32.totalorder %s12_s11, 4   ;;  %s882_s10 = smov %s884_s12 }
  0x5f   :  { %11 = sbr.rel (!%p9_p5) target bundleno = 2 (0x2), region = 61 }

</bundles_post_ra>
